<compile_context>
chip_gen: v7x
topology: tpu7x:2x2x1
jax: 0.10.0
libtpu: 0.0.40
codegen_flags: <defaults>
</compile_context>

<pallas_src>
import math
import jax
import jax.numpy as jnp
from jax import lax
from jax.experimental import pallas as pl
from jax.experimental.pallas import tpu as pltpu


def _round_up(a, b):
    return ((a + b - 1) // b) * b


def _mlp_kernel(x_ref, w1_ref, b1_ref, w2_ref, b2_ref, w3_ref, b3_ref, o_ref):
    x = x_ref[...]                       # (TILE_N, input_dim) bf16

    # fc1 + ReLU  (bf16 inputs, f32 accumulation on the MXU)
    h1 = jnp.dot(x, w1_ref[...], preferred_element_type=jnp.float32)
    h1 = jnp.maximum(h1 + b1_ref[...], 0.0)          # (TILE_N, ff) f32

    # dropout: identity in eval mode

    # fc2 + ReLU
    h2 = jnp.dot(h1.astype(jnp.bfloat16), w2_ref[...],
                 preferred_element_type=jnp.float32)
    h2 = jnp.maximum(h2 + b2_ref[...], 0.0)           # (TILE_N, emb) f32

    # fc3: contract the 64-wide feature axis of h2 against the (1, 64) w3 row.
    # The result lands directly as a lane-dense (1, TILE_N) row (batch on the
    # lane axis), avoiding a (TILE_N, 1) column output with masked stores.
    y = lax.dot_general(
        w3_ref[...], h2.astype(jnp.bfloat16),
        dimension_numbers=(((1,), (1,)), ((), ())),
        preferred_element_type=jnp.float32)            # (1, TILE_N)
    y = y + b3_ref[...]                                # (1,1) broadcasts

    o_ref[...] = y[None].astype(o_ref.dtype)           # (1, 1, TILE_N)


def _prep_params(params):
    """Weights -> bf16 (MXU-native, halves HBM bytes); biases stay f32."""
    w1, b1, w2, b2, w3, b3 = params
    return (w1.astype(jnp.bfloat16), b1.astype(jnp.float32),
            w2.astype(jnp.bfloat16), b2.astype(jnp.float32),
            w3.astype(jnp.bfloat16), b3.astype(jnp.float32))


def mlp_forward(x, params, tile_n=1024):
    """x: (N, input_dim) float32. Returns (N,) float32 (squeeze(-1) of fc3)."""
    w1, b1, w2, b2, w3, b3 = _prep_params(params)
    N, D = x.shape
    assert w3.shape[0] == 1, "module spec has output_dim == 1"

    # Tile size: multiple of 128 so the lane-dense output row is unmasked,
    # capped at `tile_n` so a 2x-buffered bf16 x tile stays well under VMEM
    # budgets on every generation (v7x: 64 MiB physical / 32 MiB scoped).
    tile_n = min(tile_n, _round_up(max(N, 1), 128))
    n_pad = _round_up(N, tile_n)
    num_tiles = pl.cdiv(n_pad, tile_n)

    xb = x.astype(jnp.bfloat16)
    if n_pad != N:
        xb = jnp.pad(xb, ((0, n_pad - N), (0, 0)))

    out = pl.pallas_call(
        _mlp_kernel,
        out_shape=jax.ShapeDtypeStruct((num_tiles, 1, tile_n), jnp.float32),
        grid=(num_tiles,),
        in_specs=[
            # x: streamed per batch tile (auto double-buffered).
            pl.BlockSpec((tile_n, D), lambda i: (i, 0)),
            # weights / biases: constant index map -> resident in VMEM.
            pl.BlockSpec(w1.shape, lambda i: (0, 0)),
            pl.BlockSpec(b1.shape, lambda i: (0, 0)),
            pl.BlockSpec(w2.shape, lambda i: (0, 0)),
            pl.BlockSpec(b2.shape, lambda i: (0, 0)),
            pl.BlockSpec(w3.shape, lambda i: (0, 0)),
            pl.BlockSpec(b3.shape, lambda i: (0, 0)),
        ],
        out_specs=pl.BlockSpec((1, 1, tile_n), lambda i: (i, 0, 0)),
        compiler_params=pltpu.CompilerParams(
            dimension_semantics=("parallel",),       # megacore on v7x
            vmem_limit_bytes=32 * 1024 * 1024,       # explicit, safe on v5e/v6e/v7x
        ),
    )(xb, w1, b1, w2, b2, w3, b3)

    return out.reshape(n_pad)[:N]                    # squeeze(-1) + drop padding


def init_mlp_params(key, input_dim=128, feed_forward_dim=64, embedding_dim=64,
                    output_dim=1):
    """Mimics the PyTorch init: uniform(-stdv, stdv), stdv = 1/sqrt(size(-1)).

    fc1/fc2 weights are stored transposed to (in, out) for the x @ W kernel
    layout; fc3's weight is kept in its native torch layout (out, emb) = (1, 64)
    because the kernel contracts it as a row. Biases are (1, out) rows.
    """
    ks = jax.random.split(key, 6)

    def u(k, shape, last_dim_size):
        stdv = 1.0 / math.sqrt(last_dim_size)
        return jax.random.uniform(k, shape, jnp.float32, minval=-stdv, maxval=stdv)

    # fc1: torch weight (ff, in) -> stored (in, ff); bias (ff,) -> (1, ff)
    w1 = u(ks[0], (input_dim, feed_forward_dim), input_dim)
    b1 = u(ks[1], (1, feed_forward_dim), feed_forward_dim)
    # fc2: torch weight (emb, ff) -> stored (ff, emb); bias (emb,) -> (1, emb)
    w2 = u(ks[2], (feed_forward_dim, embedding_dim), feed_forward_dim)
    b2 = u(ks[3], (1, embedding_dim), embedding_dim)
    # fc3: torch weight (out, emb) kept as (1, emb); bias (out,) -> (1, out)
    w3 = u(ks[4], (output_dim, embedding_dim), embedding_dim)
    b3 = u(ks[5], (1, output_dim), output_dim)
    return (w1, b1, w2, b2, w3, b3)


def mlp_reference_bf16(x, params):
    """Pure-JAX reference that mirrors the kernel's bf16-in / f32-accum math."""
    w1, b1, w2, b2, w3, b3 = _prep_params(params)
    h1 = jnp.maximum(
        jnp.dot(x.astype(jnp.bfloat16), w1, preferred_element_type=jnp.float32) + b1, 0.0)
    h2 = jnp.maximum(
        jnp.dot(h1.astype(jnp.bfloat16), w2, preferred_element_type=jnp.float32) + b2, 0.0)
    y = jnp.dot(h2.astype(jnp.bfloat16), w3.T,
                preferred_element_type=jnp.float32) + b3
    return y[:, 0]


def mlp_reference_f32(x, params):
    """Full-f32 reference of the PyTorch forward (eval mode)."""
    w1, b1, w2, b2, w3, b3 = params
    h1 = jnp.maximum(x @ w1 + b1, 0.0)
    h2 = jnp.maximum(h1 @ w2 + b2, 0.0)
    y = h2 @ w3.T + b3
    return y[:, 0]


if __name__ == "__main__":
    key = jax.random.PRNGKey(0)
    k_param, k_x = jax.random.split(key)

    input_dim, ff_dim, emb_dim, out_dim = 128, 64, 64, 1
    batch = 8

    params = init_mlp_params(k_param, input_dim, ff_dim, emb_dim, out_dim)
    x = jax.random.normal(k_x, (batch, input_dim), jnp.float32)

    y = jax.block_until_ready(mlp_forward(x, params))

    y_ref = mlp_reference_bf16(x, params)   # exact-math mirror of the kernel
    y_f32 = mlp_reference_f32(x, params)    # torch-semantics sanity check

    assert y.shape == (batch,), y.shape
    assert jnp.allclose(y, y_ref, atol=1e-3, rtol=1e-3), (y, y_ref)
    assert jnp.allclose(y, y_f32, atol=5e-2, rtol=5e-2), (y, y_f32)

    print("KERNEL_OK")
</pallas_src>

<mosaic_0001>
module attributes {stable_mosaic.version = 11 : i64} {
  func.func @_mlp_kernel(%arg0: i32, %arg1: memref<128x128xbf16, #tpu.memory_space<vmem>>, %arg2: memref<128x64xbf16, #tpu.memory_space<vmem>>, %arg3: memref<1x64xf32, #tpu.memory_space<vmem>>, %arg4: memref<64x64xbf16, #tpu.memory_space<vmem>>, %arg5: memref<1x64xf32, #tpu.memory_space<vmem>>, %arg6: memref<1x64xbf16, #tpu.memory_space<vmem>>, %arg7: memref<1x1xf32, #tpu.memory_space<vmem>>, %arg8: memref<1x1x128xf32, #tpu.memory_space<vmem>>) attributes {dimension_semantics = [#tpu.dimension_semantics<parallel>], iteration_bounds = array<i64: 1>, scalar_prefetch = 0 : i64, scratch_operands = 0 : i64, tpu.core_type = #tpu.core_type<tc>, window_params = [{transform_indices = @transform_0, window_bounds = array<i64: 128, 128>}, {pipeline_mode = #tpu.pipeline_mode<synchronous>, transform_indices = @transform_1, window_bounds = array<i64: 128, 64>}, {pipeline_mode = #tpu.pipeline_mode<synchronous>, transform_indices = @transform_2, window_bounds = array<i64: 1, 64>}, {pipeline_mode = #tpu.pipeline_mode<synchronous>, transform_indices = @transform_3, window_bounds = array<i64: 64, 64>}, {pipeline_mode = #tpu.pipeline_mode<synchronous>, transform_indices = @transform_4, window_bounds = array<i64: 1, 64>}, {pipeline_mode = #tpu.pipeline_mode<synchronous>, transform_indices = @transform_5, window_bounds = array<i64: 1, 64>}, {pipeline_mode = #tpu.pipeline_mode<synchronous>, transform_indices = @transform_6, window_bounds = array<i64: 1, 1>}, {transform_indices = @transform_7, window_bounds = array<i64: 1, 1, 128>}]} {
    %c0 = arith.constant 0 : index
    %c0_0 = arith.constant 0 : index
    %0 = vector.load %arg1[%c0, %c0_0] : memref<128x128xbf16, #tpu.memory_space<vmem>>, vector<128x128xbf16>
    %c0_1 = arith.constant 0 : index
    %c0_2 = arith.constant 0 : index
    %1 = vector.load %arg2[%c0_1, %c0_2] : memref<128x64xbf16, #tpu.memory_space<vmem>>, vector<128x64xbf16>
    %cst = arith.constant dense<0.000000e+00> : vector<128x64xf32>
    %2 = tpu.matmul %0, %1, %cst {dimension_numbers = #tpu.dot_dimension_numbers<[1], [0], [0], [1], [0, 0, 1, 1], [], []>} : vector<128x128xbf16>, vector<128x64xbf16>, vector<128x64xf32> -> vector<128x64xf32>
    %c0_3 = arith.constant 0 : index
    %c0_4 = arith.constant 0 : index
    %3 = vector.load %arg3[%c0_3, %c0_4] : memref<1x64xf32, #tpu.memory_space<vmem>>, vector<1x64xf32>
    %4 = vector.broadcast %3 : vector<1x64xf32> to vector<128x64xf32>
    %5 = arith.addf %2, %4 : vector<128x64xf32>
    %cst_5 = arith.constant 0.000000e+00 : f32
    %6 = vector.broadcast %cst_5 : f32 to vector<128x64xf32>
    %7 = arith.maximumf %5, %6 : vector<128x64xf32>
    %8 = arith.truncf %7 : vector<128x64xf32> to vector<128x64xbf16>
    %c0_6 = arith.constant 0 : index
    %c0_7 = arith.constant 0 : index
    %9 = vector.load %arg4[%c0_6, %c0_7] : memref<64x64xbf16, #tpu.memory_space<vmem>>, vector<64x64xbf16>
    %cst_8 = arith.constant dense<0.000000e+00> : vector<128x64xf32>
    %10 = tpu.matmul %8, %9, %cst_8 {dimension_numbers = #tpu.dot_dimension_numbers<[1], [0], [0], [1], [0, 0, 1, 1], [], []>} : vector<128x64xbf16>, vector<64x64xbf16>, vector<128x64xf32> -> vector<128x64xf32>
    %c0_9 = arith.constant 0 : index
    %c0_10 = arith.constant 0 : index
    %11 = vector.load %arg5[%c0_9, %c0_10] : memref<1x64xf32, #tpu.memory_space<vmem>>, vector<1x64xf32>
    %12 = vector.broadcast %11 : vector<1x64xf32> to vector<128x64xf32>
    %13 = arith.addf %10, %12 : vector<128x64xf32>
    %cst_11 = arith.constant 0.000000e+00 : f32
    %14 = vector.broadcast %cst_11 : f32 to vector<128x64xf32>
    %15 = arith.maximumf %13, %14 : vector<128x64xf32>
    %c0_12 = arith.constant 0 : index
    %c0_13 = arith.constant 0 : index
    %16 = vector.load %arg6[%c0_12, %c0_13] : memref<1x64xbf16, #tpu.memory_space<vmem>>, vector<1x64xbf16>
    %17 = arith.truncf %15 : vector<128x64xf32> to vector<128x64xbf16>
    %cst_14 = arith.constant dense<0.000000e+00> : vector<1x128xf32>
    %18 = tpu.matmul %16, %17, %cst_14 {dimension_numbers = #tpu.dot_dimension_numbers<[1], [1], [0], [0], [0, 0, 1, 0], [], []>} : vector<1x64xbf16>, vector<128x64xbf16>, vector<1x128xf32> -> vector<1x128xf32>
    %c0_15 = arith.constant 0 : index
    %c0_16 = arith.constant 0 : index
    %19 = vector.load %arg7[%c0_15, %c0_16] : memref<1x1xf32, #tpu.memory_space<vmem>>, vector<1x1xf32>
    %20 = vector.broadcast %19 : vector<1x1xf32> to vector<1x128xf32>
    %21 = arith.addf %18, %20 : vector<1x128xf32>
    %22 = vector.shape_cast %21 : vector<1x128xf32> to vector<1x1x128xf32>
    %c0_17 = arith.constant 0 : index
    %c0_18 = arith.constant 0 : index
    %c0_19 = arith.constant 0 : index
    %23 = vector.load %arg8[%c0_17, %c0_18, %c0_19] : memref<1x1x128xf32, #tpu.memory_space<vmem>>, vector<1x1x128xf32>
    tpu.vector_store %arg8[%c0_17, %c0_18, %c0_19], %22 {strides = array<i32>} : memref<1x1x128xf32, #tpu.memory_space<vmem>>, vector<1x1x128xf32>,
    return
  }
  func.func @transform_0(%arg0: i32) -> (i32, i32) {
    %c0_i32 = arith.constant 0 : i32
    %c0_i32_0 = arith.constant 0 : i32
    return %arg0, %c0_i32 : i32, i32
  }
  func.func @transform_1(%arg0: i32) -> (i32, i32) {
    %c0_i32 = arith.constant 0 : i32
    %c0_i32_0 = arith.constant 0 : i32
    %c0_i32_1 = arith.constant 0 : i32
    return %c0_i32, %c0_i32_0 : i32, i32
  }
  func.func @transform_2(%arg0: i32) -> (i32, i32) {
    %c0_i32 = arith.constant 0 : i32
    %c0_i32_0 = arith.constant 0 : i32
    %c0_i32_1 = arith.constant 0 : i32
    return %c0_i32, %c0_i32_0 : i32, i32
  }
  func.func @transform_3(%arg0: i32) -> (i32, i32) {
    %c0_i32 = arith.constant 0 : i32
    %c0_i32_0 = arith.constant 0 : i32
    %c0_i32_1 = arith.constant 0 : i32
    return %c0_i32, %c0_i32_0 : i32, i32
  }
  func.func @transform_4(%arg0: i32) -> (i32, i32) {
    %c0_i32 = arith.constant 0 : i32
    %c0_i32_0 = arith.constant 0 : i32
    %c0_i32_1 = arith.constant 0 : i32
    return %c0_i32, %c0_i32_0 : i32, i32
  }
  func.func @transform_5(%arg0: i32) -> (i32, i32) {
    %c0_i32 = arith.constant 0 : i32
    %c0_i32_0 = arith.constant 0 : i32
    %c0_i32_1 = arith.constant 0 : i32
    return %c0_i32, %c0_i32_0 : i32, i32
  }
  func.func @transform_6(%arg0: i32) -> (i32, i32) {
    %c0_i32 = arith.constant 0 : i32
    %c0_i32_0 = arith.constant 0 : i32
    %c0_i32_1 = arith.constant 0 : i32
    return %c0_i32, %c0_i32_0 : i32, i32
  }
  func.func @transform_7(%arg0: i32) -> (i32, i32, i32) {
    %c0_i32 = arith.constant 0 : i32
    %c0_i32_0 = arith.constant 0 : i32
    %c0_i32_1 = arith.constant 0 : i32
    return %arg0, %c0_i32, %c0_i32_0 : i32, i32, i32
  }
}

</mosaic_0001>

<bundles_post_ra>
// kernel: tpu_custom_call.1
= control target key start
LH: loop header
LB: loop body
LE: loop exit
PB: predicated region body
PF: predicated region fallthrough
CT: control target
= control target key end

     0   :  { %s911_s0 = inlined_call_operand.vmem [shape: bf16[128,128], index: 0, kind: input, shape index: {}]   ;;  %s912_s1 = inlined_call_operand.vmem [shape: bf16[128,64], index: 1, kind: input, shape index: {}]   ;;  %s913_s2 = inlined_call_operand.vmem [shape: f32[1,64], index: 2, kind: input, shape index: {}]   ;;  %s914_s3 = inlined_call_operand.vmem [shape: bf16[64,64], index: 3, kind: input, shape index: {}]   ;;  %s915_s4 = inlined_call_operand.vmem [shape: f32[1,64], index: 4, kind: input, shape index: {}]   ;;  %s916_s5 = inlined_call_operand.vmem [shape: bf16[1,64], index: 5, kind: input, shape index: {}]   ;;  %s917_s6 = inlined_call_operand.<no memory space> [shape: f32[1,1], index: 6, kind: input, shape index: {}]   ;;  %s918_s7 = inlined_call_operand.hbm [shape: f32[1,1,128], index: 7, kind: output, shape index: {}]  }
   0x1   :  { %v12_v0 = vstv %s917_s6 }
   0x2   :  { %13 = vst [vmem:[#allocation2] sm:$0x1] %v12_v0 }
   0x3   :  { %v713_v1 = vld [vmem:[%s912_s1] sm:$0xff]   ;;  %v714_v2 = vld [vmem:[%s912_s1 + $0x8] sm:$0xff]   ;;  %v715_v3 = vld [vmem:[%s912_s1 + $0x10] sm:$0xff]  }
   0x4   :  { %632 = vmatprep.subr.bf16.mxu0 %v713_v1  ;;  %v716_v4 = vld [vmem:[%s912_s1 + $0x18] sm:$0xff]   ;;  %v721_v5 = vld [vmem:[%s911_s0] sm:$0xff]   ;;  %v718_v7 = vld [vmem:[%s912_s1 + $0x28] sm:$0xff]  }
   0x5   :  { %633 = vmatpush3.bf16.msra.mxu0 %v713_v1  ;;  %648 = vmatprep.mubr.bf16.mxu0 %v721_v5  ;;  %v717_v6 = vld [vmem:[%s912_s1 + $0x20] sm:$0xff]   ;;  %v730_v9 = vld [vmem:[%s914_s3 + $0x8] sm:$0xff]  }
   0x6   :  { %634 = vmatprep.subr.bf16.mxu0 %v714_v2  ;;  %v729_v8 = vld [vmem:[%s914_s3] sm:$0xff]  }
   0x7   :  { %664 = vmatprep.subr.bf16.mxu1 %v729_v8 }
   0x8   :  { %665 = vmatpush3.bf16.msra.mxu1 %v729_v8 }
   0x9   :  { %635 = vmatpush3.bf16.msra.mxu0 %v714_v2 }
   0xa   :  { %636 = vmatprep.subr.bf16.mxu0 %v715_v3 }
   0xd   :  { %637 = vmatpush3.bf16.msra.mxu0 %v715_v3 }
   0xe   :  { %638 = vmatprep.subr.bf16.mxu0 %v716_v4 }
  0x11   :  { %639 = vmatpush3.bf16.msra.mxu0 %v716_v4 }
  0x12   :  { %640 = vmatprep.subr.bf16.mxu0 %v717_v6 }
  0x15   :  { %641 = vmatpush3.bf16.msra.mxu0 %v717_v6 }
  0x16   :  { %14 = vsyncpa [#allocation4], 0  ;;  %642 = vmatprep.subr.bf16.mxu0 %v718_v7  ;;  %v719_v10 = vld [vmem:[%s912_s1 + $0x30] sm:$0xff]   ;;  %666 = vmatprep.subr.bf16.mxu1 %v730_v9  ;;  %v720_v11 = vld [vmem:[%s912_s1 + $0x38] sm:$0xff]   ;;  %vm325_vm0 = vcmask 523264   ;;  %vm758_vm1 = vmmov 0  }
  0x17   :  { %667 = vmatpush3.bf16.msra.mxu1 %v730_v9  ;;  %v722_v12 = vld [vmem:[%s911_s0 + $0x8] sm:$0xff]   ;;  %v723_v13 = vld [vmem:[%s911_s0 + $0x10] sm:$0xff]   ;;  %v724_v14 = vld [vmem:[%s911_s0 + $0x18] sm:$0xff]   ;;  %s760_s19 = smov [#allocation3]  }
  0x18   :  { %v725_v15 = vld [vmem:[%s911_s0 + $0x20] sm:$0xff]   ;;  %v726_v16 = vld [vmem:[%s911_s0 + $0x28] sm:$0xff]   ;;  %v727_v17 = vld [vmem:[%s911_s0 + $0x30] sm:$0xff]   ;;  %s556_s20 = sshll.u32 %s760_s19, 4  ;;  %s557_s20 = int_to_ptr.vmem [resolvable:$true] %s556_s20 }
  0x19   :  { %643 = vmatpush3.bf16.msra.mxu0 %v718_v7  ;;  %v728_v18 = vld [vmem:[%s911_s0 + $0x38] sm:$0xff]   ;;  %v731_v19 = vld [vmem:[%s914_s3 + $0x10] sm:$0xff]   ;;  %v564_v21 = vld [vmem:[%s913_s2] ss:$0 sm:$0xff]  ;;  %s733_s21 = scalar_lea.vmem %s557_s20, 16  ;;  %s737_s22 = scalar_lea.vmem %s557_s20, 32 }
  0x1a   :  { %644 = vmatprep.subr.bf16.mxu0 %v719_v10  ;;  %668 = vmatprep.subr.bf16.mxu1 %v731_v19  ;;  %v732_v20 = vld [vmem:[%s914_s3 + $0x18] sm:$0xff]   ;;  %p734_p0 = scmp.ne.s32.totalorder %s557_s20, %s733_s21  ;;  %p738_p1 = scmp.lt.s32.totalorder %s557_s20, %s557_s20 }
  0x1b   :  { %669 = vmatpush3.bf16.msra.mxu1 %v731_v19  ;;  %p739_p2 = scmp.lt.s32.totalorder %s737_s22, %s733_s21 }
  0x1c   :  { %670 = vmatprep.subr.bf16.mxu1 %v732_v20 }
  0x1d   :  { %645 = vmatpush3.bf16.msra.mxu0 %v719_v10  ;;  %p740_p3 = por %p739_p2, %p738_p1 }
  0x1e   :  { %646 = vmatprep.subr.bf16.mxu0 %v720_v11 }
  0x1f   :  { %671 = vmatpush3.bf16.msra.mxu1 %v732_v20  ;;  %p741_p4 = pnand %p740_p3, %p734_p0 }
  0x21   :  { %647 = vmatpush3.bf16.msra.mxu0 %v720_v11 }
  0x24   :  { %649 = vmatmul.mubr.bf16.vlgmr.msra.gmra.mrb[0].mxu0 %v722_v12 }
  0x25   :  { %652 = vmatprep.mubr.bf16.mxu0 %v723_v13 }
  0x2c   :  { %653 = vmatmul.mubr.bf16.gmra.mrb[4].mxu0 %v724_v14  ;;  %v757_v14 = vmov 0.0  }
  0x2d   :  { %656 = vmatprep.mubr.bf16.mxu0 %v725_v15  ;;  %688 = vmatprep.subr.bf16.mxu1 %v757_v14  ;;  %v472_v15 = vld [vmem:[#allocation2] sm:$0x1] }
  0x34   :  { %657 = vmatmul.mubr.bf16.gmra.mrb[8].mxu0 %v726_v16  ;;  %v759_v16 = vmov 0  }
  0x35   :  { %660 = vmatprep.mubr.bf16.mxu0 %v727_v17  ;;  %712 = vset.pattern.permute.xlu0 %v759_v16  ;;  %v581_v17 = vld [vmem:[%s915_s4] ss:$0 sm:$0xff] }
  0x36   :  { %475 = vperm.xlu0 %712, %v472_v15  }
  0x3c   :  { %661 = vmatmul.mubr.bf16.gmra.mrb[12].mxu0 %v728_v18 }
  0xf7   :  { %v650_v22 = vpop.f32.mrb[0].mxu0 }
  0xf8   :  { %v208_v23 = vadd.f32 %v650_v22, %v564_v21  ;;  %v199_v24 = vpop.f32.mrb[1].mxu0 }
  0xf9   :  { %v200_v25 = vadd.f32 %v564_v21, %v199_v24  ;;  %v651_v26 = vpop.f32.mrb[2].mxu0 }
  0xfa   :  { %v211_v27 = vadd.f32 %v651_v26, %v564_v21  ;;  %v202_v28 = vpop.f32.mrb[3].mxu0  ;;  %v264_v30 = vmax.f32 %v208_v23, 0.0 }
  0xfb   :  { %v203_v29 = vadd.f32 %v564_v21, %v202_v28  ;;  %v262_v32 = vmax.f32 %v200_v25, 0.0 }
  0xfc   :  { %v265_v31 = vmax.f32 %v211_v27, 0.0 }
  0xfd   :  { %v263_v33 = vmax.f32 %v203_v29, 0.0 }
  0xfe   :  { %v279_v34 = vpack.c.bf16 %v265_v31, %v264_v30 }
  0xff   :  { %v654_v35 = vpop.f32.mrb[4].mxu0  ;;  %v278_v36 = vpack.c.bf16 %v263_v33, %v262_v32 }
 0x100   :  { %v224_v37 = vadd.f32 %v654_v35, %v564_v21  ;;  %v215_v38 = vpop.f32.mrb[5].mxu0 }
 0x101   :  { %v216_v39 = vadd.f32 %v564_v21, %v215_v38  ;;  %672 = vmatprep.mubr.msk.bf16.mxu1 %vm325_vm0, %v278_v36  ;;  %v655_v40 = vpop.f32.mrb[6].mxu0 }
 0x102   :  { %v268_v41 = vmax.f32 %v224_v37, 0.0  ;;  %v227_v42 = vadd.f32 %v655_v40, %v564_v21  ;;  %673 = vmatmul.mubr.msk.bf16.vlgmr.msra.gmra.mrb[0].mxu1 %vm325_vm0, %v279_v34  ;;  %v218_v43 = vpop.f32.mrb[7].mxu0 }
 0x103   :  { %v266_v44 = vmax.f32 %v216_v39, 0.0  ;;  %v219_v45 = vadd.f32 %v564_v21, %v218_v43 }
 0x104   :  { %v269_v46 = vmax.f32 %v227_v42, 0.0 }
 0x105   :  { %v267_v47 = vmax.f32 %v219_v45, 0.0 }
 0x106   :  { %v281_v48 = vpack.c.bf16 %v269_v46, %v268_v41 }
 0x107   :  { %v280_v49 = vpack.c.bf16 %v267_v47, %v266_v44  ;;  %v658_v50 = vpop.f32.mrb[8].mxu0 }
 0x108   :  { %v240_v51 = vadd.f32 %v658_v50, %v564_v21  ;;  %v231_v52 = vpop.f32.mrb[9].mxu0 }
 0x109   :  { %676 = vmatprep.mubr.msk.bf16.mxu1 %vm325_vm0, %v280_v49  ;;  %v232_v53 = vadd.f32 %v564_v21, %v231_v52  ;;  %v659_v54 = vpop.f32.mrb[10].mxu0 }
 0x10a   :  { %677 = vmatmul.mubr.msk.bf16.gmra.mrb[4].mxu1 %vm325_vm0, %v281_v48  ;;  %v272_v55 = vmax.f32 %v240_v51, 0.0  ;;  %v243_v56 = vadd.f32 %v659_v54, %v564_v21  ;;  %v234_v57 = vpop.f32.mrb[11].mxu0 }
 0x10b   :  { %v270_v58 = vmax.f32 %v232_v53, 0.0  ;;  %v235_v59 = vadd.f32 %v564_v21, %v234_v57 }
 0x10c   :  { %v273_v60 = vmax.f32 %v243_v56, 0.0 }
 0x10d   :  { %v271_v61 = vmax.f32 %v235_v59, 0.0 }
 0x10e   :  { %v283_v62 = vpack.c.bf16 %v273_v60, %v272_v55 }
 0x10f   :  { %v282_v63 = vpack.c.bf16 %v271_v61, %v270_v58  ;;  %v662_v0 = vpop.f32.mrb[12].mxu0 }
 0x110   :  { %v256_v1 = vadd.f32 %v662_v0, %v564_v21  ;;  %v247_v2 = vpop.f32.mrb[13].mxu0 }
 0x111   :  { %680 = vmatprep.mubr.msk.bf16.mxu1 %vm325_vm0, %v282_v63  ;;  %v248_v3 = vadd.f32 %v564_v21, %v247_v2  ;;  %v663_v4 = vpop.f32.mrb[14].mxu0 }
 0x112   :  { %681 = vmatmul.mubr.msk.bf16.gmra.mrb[8].mxu1 %vm325_vm0, %v283_v62  ;;  %v276_v5 = vmax.f32 %v256_v1, 0.0  ;;  %v259_v6 = vadd.f32 %v663_v4, %v564_v21  ;;  %v250_v7 = vpop.f32.mrb[15].mxu0 }
 0x113   :  { %v274_v8 = vmax.f32 %v248_v3, 0.0  ;;  %v251_v9 = vadd.f32 %v564_v21, %v250_v7 }
 0x114   :  { %v277_v10 = vmax.f32 %v259_v6, 0.0 }
 0x115   :  { %v275_v11 = vmax.f32 %v251_v9, 0.0 }
 0x116   :  { %v285_v12 = vpack.c.bf16 %v277_v10, %v276_v5 }
 0x117   :  { %v284_v13 = vpack.c.bf16 %v275_v11, %v274_v8 }
 0x119   :  { %684 = vmatprep.mubr.msk.bf16.mxu1 %vm325_vm0, %v284_v13 }
 0x11a   :  { %685 = vmatmul.mubr.msk.bf16.gmra.mrb[12].mxu1 %vm325_vm0, %v285_v12 }
 0x11b   :  { %704 = vmatprep.mubr.msk.bf16.mxu1 %vm758_vm1, %v757_v14 }
 0x1d5   :  { %v674_v18 = vpop.f32.mrb[0].mxu1 }
 0x1d6   :  { %v393_v19 = vadd.f32 %v674_v18, %v581_v17  ;;  %v384_v20 = vpop.f32.mrb[1].mxu1 }
 0x1d7   :  { %v385_v21 = vadd.f32 %v581_v17, %v384_v20  ;;  %v675_v22 = vpop.f32.mrb[2].mxu1  ;;  %v478_v20 = vlaneseq }
 0x1d8   :  { %v396_v23 = vadd.f32 %v675_v22, %v581_v17  ;;  %v387_v24 = vpop.f32.mrb[3].mxu1  ;;  %v449_v26 = vmax.f32 %v393_v19, 0.0  ;;  %v463_v19 = vld [vmem:[%s916_s5] sm:$0x1] }
 0x1d9   :  { %v388_v25 = vadd.f32 %v581_v17, %v387_v24  ;;  %v447_v28 = vmax.f32 %v385_v21, 0.0  ;;  %v479_v21 = vshrl.u32 %v478_v20, 7 }
 0x1da   :  { %v450_v27 = vmax.f32 %v396_v23, 0.0  ;;  %v476_v23 = vpop.permute.xlu0 %475 }
 0x1db   :  { %v448_v29 = vmax.f32 %v388_v25, 0.0  ;;  %v480_v22 = vsub.s32 0, %v479_v21 }
 0x1dc   :  { %v465_v30 = vpack.c.bf16 %v450_v27, %v449_v26 }
 0x1dd   :  { %v464_v31 = vpack.c.bf16 %v448_v29, %v447_v28  ;;  %v678_v32 = vpop.f32.mrb[4].mxu1  ;;  %v481_v24 = vrot.slane %v476_v23, %v480_v22 }
 0x1de   :  { %v409_v33 = vadd.f32 %v678_v32, %v581_v17  ;;  %v400_v34 = vpop.f32.mrb[5].mxu1  ;;  %v489_v50 = vsel %vm325_vm0, %v465_v30, 0 }
 0x1df   :  { %v401_v35 = vadd.f32 %v581_v17, %v400_v34  ;;  %v679_v36 = vpop.f32.mrb[6].mxu1  ;;  %v486_v37 = vsel %vm325_vm0, %v464_v31, 0 }
 0x1e0   :  { %v453_v38 = vmax.f32 %v409_v33, 0.0  ;;  %v412_v39 = vadd.f32 %v679_v36, %v581_v17  ;;  %689 = vmatpush3.bf16.xpose.msra.mxu1 %v486_v37  ;;  %v403_v40 = vpop.f32.mrb[7].mxu1 }
 0x1e1   :  { %v451_v41 = vmax.f32 %v401_v35, 0.0  ;;  %v404_v42 = vadd.f32 %v581_v17, %v403_v40  ;;  %690 = vmatprep.subr.bf16.mxu1 %v757_v14 }
 0x1e2   :  { %v454_v43 = vmax.f32 %v412_v39, 0.0 }
 0x1e3   :  { %v452_v44 = vmax.f32 %v404_v42, 0.0 }
 0x1e4   :  { %v467_v45 = vpack.c.bf16 %v454_v43, %v453_v38 }
 0x1e5   :  { %v466_v46 = vpack.c.bf16 %v452_v44, %v451_v41  ;;  %v682_v47 = vpop.f32.mrb[8].mxu1 }
 0x1e6   :  { %v425_v48 = vadd.f32 %v682_v47, %v581_v17  ;;  %v416_v49 = vpop.f32.mrb[9].mxu1  ;;  %v495_v13 = vsel %vm325_vm0, %v467_v45, 0 }
 0x1e7   :  { %v417_v51 = vadd.f32 %v581_v17, %v416_v49  ;;  %v683_v52 = vpop.f32.mrb[10].mxu1  ;;  %v492_v1 = vsel %vm325_vm0, %v466_v46, 0 }
 0x1e8   :  { %691 = vmatpush3.bf16.xpose.msra.mxu1 %v489_v50  ;;  %v457_v53 = vmax.f32 %v425_v48, 0.0  ;;  %v428_v54 = vadd.f32 %v683_v52, %v581_v17  ;;  %v419_v55 = vpop.f32.mrb[11].mxu1 }
 0x1e9   :  { %v455_v56 = vmax.f32 %v417_v51, 0.0  ;;  %692 = vmatprep.subr.bf16.mxu1 %v757_v14  ;;  %v420_v57 = vadd.f32 %v581_v17, %v419_v55 }
 0x1ea   :  { %v458_v58 = vmax.f32 %v428_v54, 0.0 }
 0x1eb   :  { %v456_v59 = vmax.f32 %v420_v57, 0.0 }
 0x1ec   :  { %v469_v60 = vpack.c.bf16 %v458_v58, %v457_v53 }
 0x1ed   :  { %v468_v61 = vpack.c.bf16 %v456_v59, %v455_v56  ;;  %v686_v62 = vpop.f32.mrb[12].mxu1 }
 0x1ee   :  { %v441_v63 = vadd.f32 %v686_v62, %v581_v17  ;;  %v432_v0 = vpop.f32.mrb[13].mxu1  ;;  %v501_v16 = vsel %vm325_vm0, %v469_v60, 0 }
 0x1ef   :  { %v433_v2 = vadd.f32 %v581_v17, %v432_v0  ;;  %v687_v3 = vpop.f32.mrb[14].mxu1  ;;  %v498_v15 = vsel %vm325_vm0, %v468_v61, 0 }
 0x1f0   :  { %693 = vmatpush3.bf16.xpose.msra.mxu1 %v492_v1  ;;  %v461_v4 = vmax.f32 %v441_v63, 0.0  ;;  %v444_v5 = vadd.f32 %v687_v3, %v581_v17  ;;  %v435_v6 = vpop.f32.mrb[15].mxu1 }
 0x1f1   :  { %694 = vmatprep.subr.bf16.mxu1 %v757_v14  ;;  %v459_v7 = vmax.f32 %v433_v2, 0.0  ;;  %v436_v8 = vadd.f32 %v581_v17, %v435_v6 }
 0x1f2   :  { %v462_v9 = vmax.f32 %v444_v5, 0.0 }
 0x1f3   :  { %v460_v10 = vmax.f32 %v436_v8, 0.0 }
 0x1f4   :  { %v471_v11 = vpack.c.bf16 %v462_v9, %v461_v4 }
 0x1f5   :  { %v470_v12 = vpack.c.bf16 %v460_v10, %v459_v7 }
 0x1f6   :  { %v507_v18 = vsel %vm325_vm0, %v471_v11, 0 }
 0x1f7   :  { %v504_v17 = vsel %vm325_vm0, %v470_v12, 0 }
 0x1f8   :  { %695 = vmatpush3.bf16.xpose.msra.mxu1 %v495_v13 }
 0x1f9   :  { %696 = vmatprep.subr.bf16.mxu1 %v757_v14 }
 0x200   :  { %697 = vmatpush3.bf16.xpose.msra.mxu1 %v498_v15 }
 0x201   :  { %698 = vmatprep.subr.bf16.mxu1 %v757_v14 }
 0x208   :  { %699 = vmatpush3.bf16.xpose.msra.mxu1 %v501_v16 }
 0x209   :  { %700 = vmatprep.subr.bf16.mxu1 %v757_v14 }
 0x210   :  { %701 = vmatpush3.bf16.xpose.msra.mxu1 %v504_v17 }
 0x211   :  { %702 = vmatprep.subr.bf16.mxu1 %v757_v14 }
 0x218   :  { %703 = vmatpush3.bf16.xpose.msra.mxu1 %v507_v18 }
 0x21f   :  { %705 = vmatmul.mubr.msk.bf16.vlgmr.msra.gmra.mrb[16].mxu1 %vm325_vm0, %v463_v19 }
 0x2f2   :  { %v543_v25 = vpop.f32.mrb[16].mxu1 }
 0x2f3   :  { %v544_v26 = vadd.f32 %v543_v25, %v481_v24  ;;  %v706_v27 = vpop.f32.mrb[17].mxu1 }
 0x2f4   :  { %v546_v14 = vpop.f32.mrb[18].mxu1 }
 0x2f5   :  { %549 = vst [vmem:[#allocation3] sm:$0x1] %v544_v26  ;;  %v707_v28 = vpop.f32.mrb[19].mxu1 }
 0x2f6   :  { %744 = shalt.err (!%p741_p4)
}
 0x2f7   :  { %s745_s24 = scalar_lea.hbm %s918_s7, 16 }
 0x2f8   :  { %p746_p5 = scmp.ne.s32.totalorder %s918_s7, %s745_s24  ;;  %p749_p6 = scmp.lt.u32.totalorder %s745_s24, %s918_s7 }
 0x2fa   :  { %p751_p7 = pnand %p749_p6, %p746_p5 }
 0x2fc   :  { %754 = shalt.err (!%p751_p7)
}
 0x2fd   :  { %559 = dma.vmem_to_hbm [thread:$0]  %s557_s20, 16, %s918_s7, [#allocation4]  }
 0x2fe   :  { %755 = dma.done.wait [#allocation4], 16  }
 0x2ff   :  { %756 = vsyncadd [#allocation4], 4294967280 }
 0x300   :  { %563 = vsyncpa [#allocation4], 1 }

</bundles_post_ra>
